<compile_context>
chip_gen: v5e
topology: v5e:2x2
jax: 0.10.0
libtpu: 0.0.40
codegen_flags: <defaults>
</compile_context>

<pallas_src>
import jax
import jax.numpy as jnp
from jax.experimental import pallas as pl
from jax.experimental.pallas import tpu as pltpu


def _round_up(n, m):
    return ((n + m - 1) // m) * m


def _vnet_kernel(x_ref, w1_ref, b1_ref, w2_ref, b2_ref, w3r_ref, b3_ref, out_ref):
    # Layer 1: bf16 MXU matmul (operands pre-cast in the wrapper), f32 accumulate;
    # bias-add + tanh in f32 (v5e-safe; tanh goes to the EUP slot).
    h1 = jnp.tanh(
        jnp.dot(x_ref[...], w1_ref[...], preferred_element_type=jnp.float32)
        + b1_ref[...]
    )

    # Layer 2: same, single f32->bf16 cast of the activation.
    h2 = jnp.tanh(
        jnp.dot(h1.astype(jnp.bfloat16), w2_ref[...],
                preferred_element_type=jnp.float32)
        + b2_ref[...]
    )

    # Output head (out_dim == 1), computed directly in the lane-dense (1, tm)
    # orientation: contract w3 row (1, h2) against h2 (tm, h2) over h2.
    val = jax.lax.dot_general(
        w3r_ref[...], h2.astype(jnp.bfloat16),
        dimension_numbers=(((1,), (1,)), ((), ())),
        preferred_element_type=jnp.float32,
    )  # (1, tm)
    out_ref[...] = (val + b3_ref[...]).reshape(out_ref.shape)


def _pick_row_tile(batch, max_rows):
    """Row tile (multiple of 128) targeting ~2 grid tiles for large batches."""
    if batch < 256:
        # Single full-array tile: block == array dims, always legal, no padding.
        return batch
    two_tiles = _round_up(pl.cdiv(batch, 2), 128)
    tm = min(two_tiles, max_rows, (batch // 128) * 128)  # keep block <= array
    return max(tm, 128)


def vnetwork_forward(x, params, *, max_block_rows=4096):
    """Fused MLP value-network forward.  x: (B, obs_dim) -> (B, 1) float32."""
    w1, b1, w2, b2, w3, b3 = params
    B, obs = x.shape
    h1 = w1.shape[1]
    h2 = w2.shape[1]

    # bf16 operands for the MXU.  Casting here (rather than post-DMA inside the
    # kernel) halves x's HBM stream and the weights' VMEM residency; in a real PPO
    # graph XLA fuses the convert into x's producer.
    x_bf = x.astype(jnp.bfloat16)
    w1_bf = w1.astype(jnp.bfloat16)
    w2_bf = w2.astype(jnp.bfloat16)
    w3_row = w3.T.astype(jnp.bfloat16)            # (1, h2)

    tm = _pick_row_tile(B, max_block_rows)
    num_tiles = pl.cdiv(B, tm)                    # trailing block may be partial

    const2 = lambda i: (0, 0)                     # resident weights / biases
    in_specs = [
        pl.BlockSpec((tm, obs), lambda i: (i, 0)),    # x: streamed per tile
        pl.BlockSpec((obs, h1), const2),              # w1 (bf16)
        pl.BlockSpec((1, h1), const2),                # b1 (f32)
        pl.BlockSpec((h1, h2), const2),               # w2 (bf16)
        pl.BlockSpec((1, h2), const2),                # b2 (f32)
        pl.BlockSpec((1, h2), const2),                # w3 row (bf16)
        pl.BlockSpec((1, 1), const2),                 # b3 (f32)
    ]
    # Lane-dense output: one (1, 1, tm) block per tile, batch on the lane axis.
    out_specs = pl.BlockSpec((1, 1, tm), lambda i: (i, 0, 0))

    flops = 2 * num_tiles * tm * (obs * h1 + h1 * h2 + h2)
    transcendentals = num_tiles * tm * (h1 + h2)
    bytes_accessed = (
        2 * B * obs                                  # x (bf16)
        + 4 * num_tiles * tm                         # output (f32)
        + 2 * (obs * h1 + h1 * h2 + h2)              # bf16 weights
        + 4 * (h1 + h2 + 1)                          # f32 biases
    )

    out = pl.pallas_call(
        _vnet_kernel,
        out_shape=jax.ShapeDtypeStruct((num_tiles, 1, tm), jnp.float32),
        grid=(num_tiles,),
        in_specs=in_specs,
        out_specs=out_specs,
        compiler_params=pltpu.CompilerParams(
            dimension_semantics=("parallel",),
        ),
        cost_estimate=pl.CostEstimate(
            flops=flops,
            transcendentals=transcendentals,
            bytes_accessed=bytes_accessed,
        ),
    )(x_bf, w1_bf, b1, w2_bf, b2, w3_row, b3)

    # (num_tiles, 1, tm) -> (B, 1); batch row i*tm + t lives at out[i, 0, t].
    return out.reshape(-1)[:B].reshape(B, 1)


def init_params(key, network_dims):
    """torch.nn.Linear-style init.  Biases kept 2-D (1, dim) for TPU layout."""
    keys = jax.random.split(key, 2 * (len(network_dims) - 1))
    params = []
    for idx, (d_in, d_out) in enumerate(zip(network_dims[:-1], network_dims[1:])):
        bound = 1.0 / float(d_in) ** 0.5
        w = jax.random.uniform(keys[2 * idx], (d_in, d_out), jnp.float32, -bound, bound)
        b = jax.random.uniform(keys[2 * idx + 1], (1, d_out), jnp.float32, -bound, bound)
        params.extend([w, b])
    return tuple(params)


def vnetwork_reference_f32(x, params):
    w1, b1, w2, b2, w3, b3 = params
    h1 = jnp.tanh(x @ w1 + b1)
    h2 = jnp.tanh(h1 @ w2 + b2)
    return h2 @ w3 + b3


def vnetwork_reference_matched(x, params):
    """Same math as the kernel (bf16 matmul operands, f32 accumulation)."""
    w1, b1, w2, b2, w3, b3 = params
    bf = jnp.bfloat16
    xb = x.astype(bf)
    h1 = jnp.tanh(jnp.dot(xb, w1.astype(bf), preferred_element_type=jnp.float32) + b1)
    h2 = jnp.tanh(jnp.dot(h1.astype(bf), w2.astype(bf),
                          preferred_element_type=jnp.float32) + b2)
    val = jax.lax.dot_general(
        w3.T.astype(bf), h2.astype(bf),
        dimension_numbers=(((1,), (1,)), ((), ())),
        preferred_element_type=jnp.float32,
    )  # (1, B)
    return val.T + b3


if __name__ == "__main__":
    key = jax.random.PRNGKey(0)
    k_obs, k_params = jax.random.split(key)

    network_dims = [32, 64, 64, 1]   # [obs_dim, hidden1, hidden2, value]
    params = init_params(k_params, network_dims)

    # batch=256 -> multi-tile path (tm=128, grid of 2, exercises lane-dense tiling);
    # batch=72  -> single full-array tile path (no padding, no partial blocks).
    for batch in (256, 72):
        kx = jax.random.fold_in(k_obs, batch)
        x = jax.random.normal(kx, (batch, network_dims[0]), jnp.float32)

        out = jax.block_until_ready(vnetwork_forward(x, params))
        assert out.shape == (batch, 1)

        ref_matched = vnetwork_reference_matched(x, params)
        ref_f32 = vnetwork_reference_f32(x, params)
        assert jnp.allclose(out, ref_matched, atol=2e-3, rtol=2e-3), "bf16-matched mismatch"
        assert jnp.allclose(out, ref_f32, atol=5e-2, rtol=5e-2), "f32 reference mismatch"

    print("KERNEL_OK")
</pallas_src>

<mosaic_0001>
module attributes {stable_mosaic.version = 11 : i64} {
  func.func @_vnet_kernel(%arg0: i32, %arg1: memref<128x32xbf16, #tpu.memory_space<vmem>>, %arg2: memref<32x64xbf16, #tpu.memory_space<vmem>>, %arg3: memref<1x64xf32, #tpu.memory_space<vmem>>, %arg4: memref<64x64xbf16, #tpu.memory_space<vmem>>, %arg5: memref<1x64xf32, #tpu.memory_space<vmem>>, %arg6: memref<1x64xbf16, #tpu.memory_space<vmem>>, %arg7: memref<1x1xf32, #tpu.memory_space<vmem>>, %arg8: memref<1x1x128xf32, #tpu.memory_space<vmem>>) attributes {dimension_semantics = [#tpu.dimension_semantics<parallel>], iteration_bounds = array<i64: 2>, scalar_prefetch = 0 : i64, scratch_operands = 0 : i64, tpu.core_type = #tpu.core_type<tc>, window_params = [{transform_indices = @transform_0, window_bounds = array<i64: 128, 32>}, {pipeline_mode = #tpu.pipeline_mode<synchronous>, transform_indices = @transform_1, window_bounds = array<i64: 32, 64>}, {pipeline_mode = #tpu.pipeline_mode<synchronous>, transform_indices = @transform_2, window_bounds = array<i64: 1, 64>}, {pipeline_mode = #tpu.pipeline_mode<synchronous>, transform_indices = @transform_3, window_bounds = array<i64: 64, 64>}, {pipeline_mode = #tpu.pipeline_mode<synchronous>, transform_indices = @transform_4, window_bounds = array<i64: 1, 64>}, {pipeline_mode = #tpu.pipeline_mode<synchronous>, transform_indices = @transform_5, window_bounds = array<i64: 1, 64>}, {pipeline_mode = #tpu.pipeline_mode<synchronous>, transform_indices = @transform_6, window_bounds = array<i64: 1, 1>}, {transform_indices = @transform_7, window_bounds = array<i64: 1, 1, 128>}]} {
    %c0 = arith.constant 0 : index
    %c0_0 = arith.constant 0 : index
    %0 = vector.load %arg1[%c0, %c0_0] : memref<128x32xbf16, #tpu.memory_space<vmem>>, vector<128x32xbf16>
    %c0_1 = arith.constant 0 : index
    %c0_2 = arith.constant 0 : index
    %1 = vector.load %arg2[%c0_1, %c0_2] : memref<32x64xbf16, #tpu.memory_space<vmem>>, vector<32x64xbf16>
    %cst = arith.constant dense<0.000000e+00> : vector<128x64xf32>
    %2 = tpu.matmul %0, %1, %cst {dimension_numbers = #tpu.dot_dimension_numbers<[1], [0], [0], [1], [0, 0, 1, 1], [], []>} : vector<128x32xbf16>, vector<32x64xbf16>, vector<128x64xf32> -> vector<128x64xf32>
    %c0_3 = arith.constant 0 : index
    %c0_4 = arith.constant 0 : index
    %3 = vector.load %arg3[%c0_3, %c0_4] : memref<1x64xf32, #tpu.memory_space<vmem>>, vector<1x64xf32>
    %4 = vector.broadcast %3 : vector<1x64xf32> to vector<128x64xf32>
    %5 = arith.addf %2, %4 : vector<128x64xf32>
    %6 = math.tanh %5 : vector<128x64xf32>
    %7 = arith.truncf %6 : vector<128x64xf32> to vector<128x64xbf16>
    %c0_5 = arith.constant 0 : index
    %c0_6 = arith.constant 0 : index
    %8 = vector.load %arg4[%c0_5, %c0_6] : memref<64x64xbf16, #tpu.memory_space<vmem>>, vector<64x64xbf16>
    %cst_7 = arith.constant dense<0.000000e+00> : vector<128x64xf32>
    %9 = tpu.matmul %7, %8, %cst_7 {dimension_numbers = #tpu.dot_dimension_numbers<[1], [0], [0], [1], [0, 0, 1, 1], [], []>} : vector<128x64xbf16>, vector<64x64xbf16>, vector<128x64xf32> -> vector<128x64xf32>
    %c0_8 = arith.constant 0 : index
    %c0_9 = arith.constant 0 : index
    %10 = vector.load %arg5[%c0_8, %c0_9] : memref<1x64xf32, #tpu.memory_space<vmem>>, vector<1x64xf32>
    %11 = vector.broadcast %10 : vector<1x64xf32> to vector<128x64xf32>
    %12 = arith.addf %9, %11 : vector<128x64xf32>
    %13 = math.tanh %12 : vector<128x64xf32>
    %c0_10 = arith.constant 0 : index
    %c0_11 = arith.constant 0 : index
    %14 = vector.load %arg6[%c0_10, %c0_11] : memref<1x64xbf16, #tpu.memory_space<vmem>>, vector<1x64xbf16>
    %15 = arith.truncf %13 : vector<128x64xf32> to vector<128x64xbf16>
    %cst_12 = arith.constant dense<0.000000e+00> : vector<1x128xf32>
    %16 = tpu.matmul %14, %15, %cst_12 {dimension_numbers = #tpu.dot_dimension_numbers<[1], [1], [0], [0], [0, 0, 1, 0], [], []>} : vector<1x64xbf16>, vector<128x64xbf16>, vector<1x128xf32> -> vector<1x128xf32>
    %c0_13 = arith.constant 0 : index
    %c0_14 = arith.constant 0 : index
    %17 = vector.load %arg7[%c0_13, %c0_14] : memref<1x1xf32, #tpu.memory_space<vmem>>, vector<1x1xf32>
    %18 = vector.broadcast %17 : vector<1x1xf32> to vector<1x128xf32>
    %19 = arith.addf %16, %18 : vector<1x128xf32>
    %20 = vector.shape_cast %19 : vector<1x128xf32> to vector<1x1x128xf32>
    %c0_15 = arith.constant 0 : index
    %c0_16 = arith.constant 0 : index
    %c0_17 = arith.constant 0 : index
    %21 = vector.load %arg8[%c0_15, %c0_16, %c0_17] : memref<1x1x128xf32, #tpu.memory_space<vmem>>, vector<1x1x128xf32>
    tpu.vector_store %arg8[%c0_15, %c0_16, %c0_17], %20 {strides = array<i32>} : memref<1x1x128xf32, #tpu.memory_space<vmem>>, vector<1x1x128xf32>,
    return
  }
  func.func @transform_0(%arg0: i32) -> (i32, i32) {
    %c0_i32 = arith.constant 0 : i32
    %c0_i32_0 = arith.constant 0 : i32
    return %arg0, %c0_i32 : i32, i32
  }
  func.func @transform_1(%arg0: i32) -> (i32, i32) {
    %c0_i32 = arith.constant 0 : i32
    %c0_i32_0 = arith.constant 0 : i32
    %c0_i32_1 = arith.constant 0 : i32
    return %c0_i32, %c0_i32_0 : i32, i32
  }
  func.func @transform_2(%arg0: i32) -> (i32, i32) {
    %c0_i32 = arith.constant 0 : i32
    %c0_i32_0 = arith.constant 0 : i32
    %c0_i32_1 = arith.constant 0 : i32
    return %c0_i32, %c0_i32_0 : i32, i32
  }
  func.func @transform_3(%arg0: i32) -> (i32, i32) {
    %c0_i32 = arith.constant 0 : i32
    %c0_i32_0 = arith.constant 0 : i32
    %c0_i32_1 = arith.constant 0 : i32
    return %c0_i32, %c0_i32_0 : i32, i32
  }
  func.func @transform_4(%arg0: i32) -> (i32, i32) {
    %c0_i32 = arith.constant 0 : i32
    %c0_i32_0 = arith.constant 0 : i32
    %c0_i32_1 = arith.constant 0 : i32
    return %c0_i32, %c0_i32_0 : i32, i32
  }
  func.func @transform_5(%arg0: i32) -> (i32, i32) {
    %c0_i32 = arith.constant 0 : i32
    %c0_i32_0 = arith.constant 0 : i32
    %c0_i32_1 = arith.constant 0 : i32
    return %c0_i32, %c0_i32_0 : i32, i32
  }
  func.func @transform_6(%arg0: i32) -> (i32, i32) {
    %c0_i32 = arith.constant 0 : i32
    %c0_i32_0 = arith.constant 0 : i32
    %c0_i32_1 = arith.constant 0 : i32
    return %c0_i32, %c0_i32_0 : i32, i32
  }
  func.func @transform_7(%arg0: i32) -> (i32, i32, i32) {
    %c0_i32 = arith.constant 0 : i32
    %c0_i32_0 = arith.constant 0 : i32
    %c0_i32_1 = arith.constant 0 : i32
    return %arg0, %c0_i32, %c0_i32_0 : i32, i32, i32
  }
}

</mosaic_0001>

<bundles_post_ra>
// kernel: tpu_custom_call.1
= control target key start
LH: loop header
LB: loop body
LE: loop exit
PB: predicated region body
PF: predicated region fallthrough
CT: control target
= control target key end

     0   :  { %s1212_s0 = inlined_call_operand.vmem [shape: bf16[256,32], index: 0, kind: input, shape index: {}]   ;;  %s1213_s1 = inlined_call_operand.vmem [shape: bf16[32,64], index: 1, kind: input, shape index: {}]   ;;  %s1214_s2 = inlined_call_operand.vmem [shape: f32[1,64], index: 2, kind: input, shape index: {}]   ;;  %s1215_s3 = inlined_call_operand.vmem [shape: bf16[64,64], index: 3, kind: input, shape index: {}]   ;;  %s1216_s4 = inlined_call_operand.vmem [shape: f32[1,64], index: 4, kind: input, shape index: {}]   ;;  %s1217_s5 = inlined_call_operand.vmem [shape: bf16[1,64], index: 5, kind: input, shape index: {}]   ;;  %s1218_s6 = inlined_call_operand.<no memory space> [shape: f32[1,1], index: 6, kind: input, shape index: {}]   ;;  %s1219_s7 = inlined_call_operand.hbm [shape: f32[2,1,128], index: 7, kind: output, shape index: {}]  }
   0x1   :  { %v12_v0 = vstv %s1218_s6 }
   0x2   :  { %13 = vst [vmem:[#allocation2] sm:$0x1] %v12_v0 }
   0x3   :  { %14 = vsyncpa [#allocation4], 0 }
   0x4   :  { %16 = vsyncpa [#allocation4 + $0x1], 0  ;;  %s1022_s26 = smov 0   ;;  %s1024_s27 = smov 0  }
   0x5   :  { %s1026_s28 = smov 0   ;;  %s1028_s29 = smov 0  }
   0x6 LB: > { %s1043_s6 = sadd.s32 4294967295, %s976_s29   ;;  %s706_s30 = sadd.s32 4294967294, %s976_s29   ;;  %s976_s29 = sphi %s1028_s29, %s1225_s29   ;;  %s972_s28 = sphi %s1026_s28, %s1224_s28   ;;  %s968_s27 = sphi %s1024_s27, %s1223_s27   ;;  %s964_s26 = sphi %s1022_s26, %s1222_s26  }
   0x7   : > { %s1047_s8 = sadd.s32 1, %s976_s29   ;;  %s181_s9 = sadd.s32 1, %s972_s28 }
   0x8   : > { %s178_s10 = ssub.s32 %s976_s29, %s1047_s8  ;;  %p191_p0 = scmp.ne.s32.totalorder %s972_s28, %s968_s27 }
   0x9   : > { %p179_p1 = scmp.eq.s32.totalorder %s178_s10, 0  ;;  %p192_p2 = scmp.eq.s32.totalorder %s1043_s6, 1 }
   0xa   : > { %p197_p3 = scmp.ne.s32.totalorder %s968_s27, %s964_s26  ;;  %p198_p4 = scmp.eq.s32.totalorder %s706_s30, 1 }
   0xb   : > { %s1058_s11 = scalar_select %p179_p1, %s972_s28, %s181_s9  }
   0xc   : > { %p1060_p5 = por %p192_p2, %p191_p0  ;;  %p1064_p6 = por %p198_p4, %p197_p3 }
   0xd   : > { %p709_p7 = scmp.ge.s32.totalorder %s976_s29, 1  ;;  %p243_p8 = scmp.lt.s32.totalorder %s976_s29, 3 }
   0xf   : > { %p244_p9 = pnand %p709_p7, %p243_p8 }
  0x10   : > { %s710_s16 = sshll.u32 (!%p244_p9), %s1043_s6, 4  ;;  %s647_s25 = scalar_lea.hbm (!%p244_p9), %s1219_s7, %s1043_s6 }
  0x11   : > { %247 = sbr.rel (%p244_p9) target bundleno = 642 (0x282), region = 48  ;;  %p275_p10 = scmp.lt.s32.totalorder (!%p244_p9), %s710_s16, 31 }
  0x12   : > { %s651_s10 = sshll.u32 (!%p244_p9), %s647_s25, 4  ;;  %s934_s6 = scalar_lea.hbm (!%p244_p9), %s1219_s7, 2  ;;  %s652_s10 = int_to_ptr.hbm [resolvable:$true] %s651_s10 }
  0x13   : > { %s928_s15 = sshra.s32 (!%p244_p9), %s652_s10, 4  ;;  %s929_s15 = int_to_ptr.hbm [resolvable:$true] %s928_s15 }
  0x14   : > { %p935_p0 = scmp.lt.s32.totalorder (!%p244_p9), %s929_s15, %s1219_s7 }
  0x16   : > { %v796_v1 = vld [vmem:[%s1213_s1 + $0x8] sm:$0xff]  ;;  %v795_v2 = vld [vmem:[%s1213_s1] sm:$0xff]  ;;  %s1227_s16 = smov (!%p275_p10, %s710_s16), 31  ;;  %vm357_vm0 = vcmask 261120   ;;  %v800_v11 = vld [vmem:[%s1215_s3 + $0x18] sm:$0xff]  ;;  %vm491_vm1 = vcmask 523264  }
  0x17   : > { %388 = vmatpush.bf16.msra.mxu0 %v796_v1  ;;  %801 = vmatpush.bf16.msra.mxu3 %v796_v1  ;;  %s711_s19 = sshll.u32 %s1227_s16, 2  ;;  %v799_v12 = vld [vmem:[%s1215_s3 + $0x10] sm:$0xff]  ;;  %v798_v13 = vld [vmem:[%s1215_s3 + $0x8] sm:$0xff]  ;;  %v797_v14 = vld [vmem:[%s1215_s3] sm:$0xff]  ;;  %s930_s16 = scalar_lea.hbm %s929_s15, 1 }
  0x18   : > { %s278_s22 = scalar_lea.vmem %s1212_s0, %s711_s19  ;;  %520 = vmatpush.bf16.msra.mxu1 %v800_v11  ;;  %v1103_v16 = vld [vmem:[%s1214_s2] ss:$0 sm:$0xff]  ;;  %p931_p11 = scmp.ne.s32.totalorder %s929_s15, %s930_s16 }
  0x19   : > { %v787_v3 = vld [vmem:[%s278_s22] sm:$0xff]  ;;  %v788_v4 = vld [vmem:[%s278_s22 + $0x8] sm:$0xff]  ;;  %v789_v5 = vld [vmem:[%s278_s22 + $0x10] sm:$0xff]  ;;  %p936_p1 = scmp.lt.s32.totalorder %s934_s6, %s930_s16 }
  0x1a   : > { %v790_v6 = vld [vmem:[%s278_s22 + $0x18] sm:$0xff]  ;;  %v793_v7 = vld [vmem:[%s278_s22 + $0x30] sm:$0xff]  ;;  %v791_v8 = vld [vmem:[%s278_s22 + $0x20] sm:$0xff]  ;;  %p932_p12 = pnand %p931_p11, %p1060_p5 }
  0x1b   : > { %389 = vmatpush.bf16.msra.mxu0 %v795_v2  ;;  %802 = vmatpush.bf16.msra.mxu3 %v795_v2  ;;  %v794_v9 = vld [vmem:[%s278_s22 + $0x38] sm:$0xff]  ;;  %v792_v10 = vld [vmem:[%s278_s22 + $0x28] sm:$0xff]  ;;  %s272_s22 = sand.u32 1, %s968_s27   ;;  %p937_p2 = por %p936_p1, %p935_p0 }
  0x1c   : > { %521 = vmatpush.bf16.msra.mxu1 %v799_v12  ;;  %s273_s30 = scalar_lea.vmem [#allocation3], %s272_s22  ;;  %s639_s14 = scalar_lea.sflag [#allocation4], %s272_s22 }
  0x1d   : > { %s649_s9 = sshll.u32 %s273_s30, 4  ;;  %p933_p13 = pneg %p932_p12  ;;  %s650_s9 = int_to_ptr.vmem [resolvable:$true] %s649_s9 }
  0x1e   : > { %752 = vmatmul.msk.bf16.vlgmr.msra.gmra.mxu0 %vm357_vm0, %v787_v3  ;;  %758 = vmatmul.msk.bf16.vlgmr.msra.gmra.mxu3 %vm357_vm0, %v793_v7 }
  0x1f   : > { %803 = vmatpush.bf16.msrb.mxu3 %v800_v11  ;;  %p938_p3 = pnand %p937_p2, %p933_p13 }
  0x20   : > { %522 = vmatpush.bf16.msra.mxu1 %v798_v13 }
  0x23   : > { %804 = vmatpush.bf16.msrb.mxu3 %v799_v12 }
  0x24   : > { %523 = vmatpush.bf16.msra.mxu1 %v797_v14 }
  0x27   : > { %805 = vmatpush.bf16.msrb.mxu3 %v798_v13 }
  0x2b   : > { %806 = vmatpush.bf16.msrb.mxu3 %v797_v14 }
  0x2e   : > { %753 = vmatmul.msk.bf16.gmra.mxu0 %vm357_vm0, %v788_v4  ;;  %759 = vmatmul.msk.bf16.gmra.mxu3 %vm357_vm0, %v794_v9  ;;  %v1132_v9 = vld [vmem:[%s1216_s4] ss:$0 sm:$0xff] }
  0x3e   : > { %754 = vmatmul.msk.bf16.gmra.mxu0 %vm357_vm0, %v789_v5 }
  0x4e   : > { %755 = vmatmul.msk.bf16.gmra.mxu0 %vm357_vm0, %v790_v6 }
  0x5e   : > { %756 = vmatmul.msk.bf16.gmra.mxu0 %vm357_vm0, %v791_v8 }
  0x6e   : > { %757 = vmatmul.msk.bf16.gmra.mxu0 %vm357_vm0, %v792_v10 }
  0x9b   : > { %v391_v15 = vpop.f32.mrf.mxu0 }
  0x9c   : > { %v392_v17 = vadd.f32 %v1103_v16, %v391_v15 }
  0x9e   : > { %850 = vtanh.f32 %v392_v17 }
  0xa1   : > { %v421_v52 = vpop.f32.mrf.mxu3 }
  0xa2   : > { %v422_v60 = vadd.f32 %v1103_v16, %v421_v52 }
  0xa3   : > { %v393_v18 = vpop.f32.mrf.mxu0 }
  0xa4   : > { %v394_v19 = vadd.f32 %v1103_v16, %v393_v18  ;;  %v851_v20 = vpop.eup %850 }
  0xa6   : > { %852 = vtanh.f32 %v394_v19 }
  0xa9   : > { %v423_v56 = vpop.f32.mrf.mxu3 }
  0xaa   : > { %v424_v61 = vadd.f32 %v1103_v16, %v423_v56 }
  0xab   : > { %v396_v21 = vpop.f32.mrf.mxu0 }
  0xac   : > { %v853_v22 = vpop.eup %852  ;;  %v397_v24 = vadd.f32 %v1103_v16, %v396_v21 }
  0xad   : > { %v447_v23 = vpack.c.bf16 %v853_v22, %v851_v20 }
  0xae   : > { %854 = vtanh.f32 %v397_v24 }
  0xaf   : > { %776 = vmatmul.msk.bf16.vlgmr.msra.gmra.mxu1 %vm491_vm1, %v447_v23 }
  0xb1   : > { %v426_v62 = vpop.f32.mrf.mxu3 }
  0xb2   : > { %v427_v3 = vadd.f32 %v1103_v16, %v426_v62 }
  0xb3   : > { %v398_v25 = vpop.f32.mrf.mxu0 }
  0xb4   : > { %v399_v26 = vadd.f32 %v1103_v16, %v398_v25  ;;  %v855_v27 = vpop.eup %854 }
  0xb6   : > { %856 = vtanh.f32 %v399_v26 }
  0xb9   : > { %v428_v1 = vpop.f32.mrf.mxu3 }
  0xba   : > { %v429_v4 = vadd.f32 %v1103_v16, %v428_v1 }
  0xbb   : > { %v401_v28 = vpop.f32.mrf.mxu0 }
  0xbc   : > { %v857_v29 = vpop.eup %856  ;;  %v402_v31 = vadd.f32 %v1103_v16, %v401_v28 }
  0xbd   : > { %v448_v30 = vpack.c.bf16 %v857_v29, %v855_v27 }
  0xbe   : > { %858 = vtanh.f32 %v402_v31 }
  0xbf   : > { %777 = vmatmul.msk.bf16.gmra.mxu1 %vm491_vm1, %v448_v30 }
  0xc3   : > { %v403_v32 = vpop.f32.mrf.mxu0 }
  0xc4   : > { %v404_v33 = vadd.f32 %v1103_v16, %v403_v32  ;;  %v859_v34 = vpop.eup %858 }
  0xc6   : > { %860 = vtanh.f32 %v404_v33 }
  0xcb   : > { %v406_v35 = vpop.f32.mrf.mxu0 }
  0xcc   : > { %v861_v36 = vpop.eup %860  ;;  %v407_v38 = vadd.f32 %v1103_v16, %v406_v35 }
  0xcd   : > { %v449_v37 = vpack.c.bf16 %v861_v36, %v859_v34 }
  0xce   : > { %862 = vtanh.f32 %v407_v38 }
  0xcf   : > { %778 = vmatmul.msk.bf16.gmra.mxu1 %vm491_vm1, %v449_v37 }
  0xd3   : > { %v408_v39 = vpop.f32.mrf.mxu0 }
  0xd4   : > { %v409_v40 = vadd.f32 %v1103_v16, %v408_v39  ;;  %v863_v41 = vpop.eup %862 }
  0xd6   : > { %864 = vtanh.f32 %v409_v40 }
  0xdb   : > { %v411_v42 = vpop.f32.mrf.mxu0 }
  0xdc   : > { %v865_v43 = vpop.eup %864  ;;  %v412_v45 = vadd.f32 %v1103_v16, %v411_v42 }
  0xdd   : > { %v450_v44 = vpack.c.bf16 %v865_v43, %v863_v41 }
  0xde   : > { %866 = vtanh.f32 %v412_v45 }
  0xdf   : > { %779 = vmatmul.msk.bf16.gmra.mxu1 %vm491_vm1, %v450_v44 }
  0xe3   : > { %v413_v46 = vpop.f32.mrf.mxu0 }
  0xe4   : > { %v414_v47 = vadd.f32 %v1103_v16, %v413_v46  ;;  %v867_v48 = vpop.eup %866 }
  0xe6   : > { %868 = vtanh.f32 %v414_v47 }
  0xeb   : > { %v416_v49 = vpop.f32.mrf.mxu0 }
  0xec   : > { %v869_v50 = vpop.eup %868  ;;  %v417_v53 = vadd.f32 %v1103_v16, %v416_v49 }
  0xed   : > { %v451_v51 = vpack.c.bf16 %v869_v50, %v867_v48 }
  0xee   : > { %870 = vtanh.f32 %v417_v53 }
  0xef   : > { %780 = vmatmul.msk.bf16.gmra.mxu1 %vm491_vm1, %v451_v51 }
  0xf3   : > { %v418_v54 = vpop.f32.mrf.mxu0 }
  0xf4   : > { %v419_v55 = vadd.f32 %v1103_v16, %v418_v54  ;;  %v871_v57 = vpop.eup %870 }
  0xf6   : > { %872 = vtanh.f32 %v419_v55 }
  0xf7   : > { %874 = vtanh.f32 %v422_v60 }
  0xf8   : > { %876 = vtanh.f32 %v424_v61 }
  0xf9   : > { %878 = vtanh.f32 %v427_v3  ;;  %v590_v3 = vld [vmem:[#allocation2] sm:$0x1] }
  0xfa   : > { %880 = vtanh.f32 %v429_v4 }
  0xfc   : > { %v873_v58 = vpop.eup %872 }
  0xfd   : > { %v452_v59 = vpack.c.bf16 %v873_v58, %v871_v57  ;;  %v875_v63 = vpop.eup %874 }
  0xfe   : > { %v877_v0 = vpop.eup %876 }
  0xff   : > { %781 = vmatmul.msk.bf16.vlgmr.msrb.gmra.mxu3 %vm491_vm1, %v452_v59  ;;  %v453_v2 = vpack.c.bf16 %v877_v0, %v875_v63  ;;  %v879_v5 = vpop.eup %878 }
 0x100   : > { %v881_v6 = vpop.eup %880 }
 0x101   : > { %v454_v7 = vpack.c.bf16 %v881_v6, %v879_v5  ;;  %v978_v5 = vmov 0  }
 0x102   : > { %847 = vset.pattern.permute.xlu0 %v978_v5 }
 0x103   : > { %593 = vperm.xlu0 %847, %v590_v3  }
 0x10f   : > { %782 = vmatmul.msk.bf16.gmra.mxu3 %vm491_vm1, %v453_v2 }
 0x11f   : > { %783 = vmatmul.msk.bf16.gmra.mxu3 %vm491_vm1, %v454_v7 }
 0x12c   : > { %v525_v8 = vpop.f32.mrf.mxu1 }
 0x12d   : > { %v526_v10 = vadd.f32 %v1132_v9, %v525_v8 }
 0x12f   : > { %882 = vtanh.f32 %v526_v10 }
 0x134   : > { %v527_v11 = vpop.f32.mrf.mxu1 }
 0x135   : > { %v528_v12 = vadd.f32 %v1132_v9, %v527_v11  ;;  %v1136_v13 = vpop.eup %882  ;;  %v581_v11 = vld [vmem:[%s1217_s5] sm:$0x1] }
 0x137   : > { %884 = vtanh.f32 %v528_v12 }
 0x13c   : > { %v530_v14 = vpop.f32.mrf.mxu1 }
 0x13d   : > { %v1138_v15 = vpop.eup %884  ;;  %v531_v17 = vadd.f32 %v1132_v9, %v530_v14 }
 0x13e   : > { %v582_v16 = vpack.c.bf16 %v1138_v15, %v1136_v13 }
 0x13f   : > { %886 = vtanh.f32 %v531_v17 }
 0x140   : > { %v601_v10 = vsel %vm491_vm1, %v582_v16, 0 }
 0x144   : > { %v532_v18 = vpop.f32.mrf.mxu1 }
 0x145   : > { %v533_v19 = vadd.f32 %v1132_v9, %v532_v18  ;;  %v1144_v20 = vpop.eup %886 }
 0x147   : > { %888 = vtanh.f32 %v533_v19 }
 0x14c   : > { %v535_v24 = vpop.f32.mrf.mxu1 }
 0x14d   : > { %v1146_v21 = vpop.eup %888  ;;  %v536_v63 = vadd.f32 %v1132_v9, %v535_v24 }
 0x14e   : > { %v583_v22 = vpack.c.bf16 %v1146_v21, %v1144_v20 }
 0x154   : > { %v537_v26 = vpop.f32.mrf.mxu1 }
 0x155   : > { %v538_v60 = vadd.f32 %v1132_v9, %v537_v26 }
 0x15c   : > { %v540_v29 = vpop.f32.mrf.mxu1 }
 0x15d   : > { %v541_v57 = vadd.f32 %v1132_v9, %v540_v29 }
 0x164   : > { %v542_v31 = vpop.f32.mrf.mxu1 }
 0x165   : > { %v543_v54 = vadd.f32 %v1132_v9, %v542_v31 }
 0x16c   : > { %v545_v37 = vpop.f32.mrf.mxu1 }
 0x16d   : > { %v546_v51 = vadd.f32 %v1132_v9, %v545_v37 }
 0x174   : > { %v547_v46 = vpop.f32.mrf.mxu1 }
 0x175   : > { %v548_v48 = vadd.f32 %v1132_v9, %v547_v46  ;;  %v594_v12 = vpop.permute.xlu0 %593 }
 0x176   : > { %v596_v14 = vperm.slane %v594_v12, 0 }
 0x182   : > { %v550_v23 = vpop.f32.mrf.mxu3 }
 0x183   : > { %v551_v44 = vadd.f32 %v1132_v9, %v550_v23 }
 0x18a   : > { %v552_v25 = vpop.f32.mrf.mxu3 }
 0x18b   : > { %v553_v41 = vadd.f32 %v1132_v9, %v552_v25 }
 0x192   : > { %v555_v27 = vpop.f32.mrf.mxu3 }
 0x193   : > { %v556_v36 = vadd.f32 %v1132_v9, %v555_v27 }
 0x19a   : > { %v557_v28 = vpop.f32.mrf.mxu3 }
 0x19b   : > { %v558_v35 = vadd.f32 %v1132_v9, %v557_v28 }
 0x1a2   : > { %v560_v30 = vpop.f32.mrf.mxu3 }
 0x1a3   : > { %v561_v32 = vadd.f32 %v1132_v9, %v560_v30 }
 0x1a5   : > { %890 = vtanh.f32 %v561_v32 }
 0x1aa   : > { %v562_v33 = vpop.f32.mrf.mxu3 }
 0x1ab   : > { %v563_v34 = vadd.f32 %v1132_v9, %v562_v33  ;;  %v891_v38 = vpop.eup %890  ;;  %v604_v9 = vsel %vm491_vm1, %v583_v22, 0 }
 0x1ad   : > { %892 = vtanh.f32 %v563_v34 }
 0x1ae   : > { %894 = vtanh.f32 %v558_v35 }
 0x1af   : > { %896 = vtanh.f32 %v556_v36 }
 0x1b0   : > { %898 = vtanh.f32 %v553_v41 }
 0x1b1   : > { %900 = vtanh.f32 %v551_v44 }
 0x1b2   : > { %902 = vtanh.f32 %v548_v48 }
 0x1b3   : > { %v893_v39 = vpop.eup %892  ;;  %904 = vtanh.f32 %v546_v51 }
 0x1b4   : > { %v589_v40 = vpack.c.bf16 %v893_v39, %v891_v38  ;;  %v895_v43 = vpop.eup %894  ;;  %906 = vtanh.f32 %v543_v54 }
 0x1b5   : > { %v897_v45 = vpop.eup %896  ;;  %908 = vtanh.f32 %v541_v57 }
 0x1b6   : > { %v622_v42 = vsel %vm491_vm1, %v589_v40, 0  ;;  %v588_v47 = vpack.c.bf16 %v895_v43, %v897_v45  ;;  %v899_v50 = vpop.eup %898  ;;  %910 = vtanh.f32 %v538_v60 }
 0x1b7   : > { %624 = vmatpush.bf16.xpose.msra.mxu2 %v622_v42  ;;  %v901_v52 = vpop.eup %900  ;;  %912 = vtanh.f32 %v536_v63 }
 0x1b8   : > { %v619_v49 = vsel %vm491_vm1, %v588_v47, 0  ;;  %v587_v53 = vpack.c.bf16 %v899_v50, %v901_v52  ;;  %v903_v56 = vpop.eup %902 }
 0x1b9   : > { %v905_v58 = vpop.eup %904 }
 0x1ba   : > { %v616_v55 = vsel %vm491_vm1, %v587_v53, 0  ;;  %v586_v59 = vpack.c.bf16 %v903_v56, %v905_v58  ;;  %v907_v62 = vpop.eup %906 }
 0x1bb   : > { %v909_v0 = vpop.eup %908 }
 0x1bc   : > { %v613_v61 = vsel %vm491_vm1, %v586_v59, 0  ;;  %v585_v1 = vpack.c.bf16 %v907_v62, %v909_v0  ;;  %v911_v4 = vpop.eup %910 }
 0x1bd   : > { %v913_v6 = vpop.eup %912 }
 0x1be   : > { %v610_v2 = vsel %vm491_vm1, %v585_v1, 0  ;;  %v584_v7 = vpack.c.bf16 %v911_v4, %v913_v6 }
 0x1bf   : > { %625 = vmatpush.bf16.xpose.msra.mxu2 %v619_v49 }
 0x1c0   : > { %v607_v8 = vsel %vm491_vm1, %v584_v7, 0 }
 0x1c7   : > { %626 = vmatpush.bf16.xpose.msra.mxu2 %v616_v55 }
 0x1cf   : > { %627 = vmatpush.bf16.xpose.msra.mxu2 %v613_v61 }
 0x1d7   : > { %628 = vmatpush.bf16.xpose.msra.mxu2 %v610_v2 }
 0x1df   : > { %629 = vmatpush.bf16.xpose.msra.mxu2 %v607_v8 }
 0x1e7   : > { %630 = vmatpush.bf16.xpose.msra.mxu2 %v604_v9 }
 0x1ef   : > { %631 = vmatpush.bf16.xpose.msra.mxu2 %v601_v10 }
 0x1f6   : > { %784 = vmatmul.msk.bf16.vlgmr.msra.gmra.mxu2 %vm491_vm1, %v581_v11 }
 0x279   : > { %v633_v13 = vpop.f32.mrf.mxu2 }
 0x27a   : > { %v634_v15 = vadd.f32 %v633_v13, %v596_v14 }
 0x27c   : > { %637 = vst [vmem:[%s273_s30] sm:$0x1] %v634_v15 }
 0x27d   : > { %941 = shalt.err (!%p938_p3)
}
 0x27e   : > { %807 = dma.vmem_to_hbm [thread:$0]  (%p1060_p5), %s650_s9, 16, %s652_s10, %s639_s14  }
 0x281   : > { %v635_v16 = vpop.f32.mrf.mxu2 }
 0x282 PF: > { %p813_p4 = scmp.ge.s32.totalorder %s976_s29, 2  ;;  %s663_s21 = sand.u32 1, %s964_s26  }
 0x283   : > { %s664_s22 = scalar_lea.sflag [#allocation4], %s663_s21 }
 0x284   : > { %p810_p7 = pnand %p813_p4, %p1064_p6 }
 0x286   : > { %p811_p8 = pneg %p810_p7 }
 0x288   : > { %959 = dma.done.wait (%p811_p8), %s664_s22, 16  }
 0x289   : > { %961 = vsyncadd (%p811_p8), %s664_s22, 4294967280  ;;  %p19_p9 = scmp.ge.s32.totalorder %s1047_s8, 4   ;;  %s1222_s26 = smov %s968_s27 }
 0x28a   : > { %s1223_s27 = smov %s972_s28  ;;  %s1224_s28 = smov %s1058_s11 }
 0x28b   : > { %s1225_s29 = smov %s1047_s8  ;;  %21 = sbr.rel (!%p19_p9) target bundleno = 6 (0x6), region = 83 }
 0x290   :  { %669 = vsyncpa [#allocation4], 1 }
 0x291   :  { %671 = vsyncpa [#allocation4 + $0x1], 1 }

</bundles_post_ra>
